<compile_context>
chip_gen: v7x
topology: tpu7x:2x2x1
jax: 0.10.0
libtpu: 0.0.40
codegen_flags: <defaults>
</compile_context>

<pallas_src>
import functools

import jax
import jax.numpy as jnp
from jax.experimental import pallas as pl
from jax.experimental.pallas import tpu as pltpu

HIDDEN = 256  # fixed by the module (fc1/fc2 are nn.Linear(*, 256))


def _round_up(x: int, m: int) -> int:
    return ((x + m - 1) // m) * m


def _default_bf16_epilogue() -> bool:
    """bf16 elementwise epilogue only where the VPU has a bf16 datapath."""
    try:
        kind = jax.devices()[0].device_kind.lower()
    except Exception:
        return False
    # v5e and older would unpack/emulate bf16 elementwise -> keep f32 there.
    return not any(g in kind for g in ("v2", "v3", "v4", "v5"))


def _choose_tile_b(B: int) -> int:
    if B <= 512:
        # Small batch: one tile, minimal padding (16-row align for bf16 sublanes).
        return _round_up(max(B, 1), 16)
    # Large batch: >=4 grid steps (v7x's two TCs each get >=2), 256-aligned
    # (MXU M block on v6e/v7x), capped at 2048 to stay far below VMEM limits.
    return max(256, min(2048, _round_up(pl.cdiv(B, 4), 256)))


# ---------------------------------------------------------------------------
# Kernel
# ---------------------------------------------------------------------------
def qnet_kernel(x_ref, w1_ref, b1_ref, w2_ref, b2_ref, w3_ref, b3_ref, out_ref):
    # Epilogue dtype (bias add / ReLU / residual) is carried by the bias dtype:
    # bf16 on v6e/v7x, f32 on v5e.  All matmuls accumulate in f32 on the MXU.
    ep = b1_ref.dtype
    x = x_ref[...]                                           # (TILE_B, S) bf16

    # h = relu(fc1(x))
    h = jnp.maximum(
        jnp.dot(x, w1_ref[...], preferred_element_type=jnp.float32).astype(ep)
        + b1_ref[...],
        0,
    )                                                        # (TILE_B, H) ep

    # y = relu(fc2(h))
    y = jnp.maximum(
        jnp.dot(h.astype(w2_ref.dtype), w2_ref[...],
                preferred_element_type=jnp.float32).astype(ep)
        + b2_ref[...],
        0,
    )                                                        # (TILE_B, H) ep

    # out = fc3(h + y)  -- residual add in ep dtype, f32 accumulate, bf16 store.
    hy = (h + y).astype(w3_ref.dtype)
    out_ref[...] = (
        jnp.dot(hy, w3_ref[...], preferred_element_type=jnp.float32) + b3_ref[...]
    ).astype(out_ref.dtype)


# ---------------------------------------------------------------------------
# One-time parameter preparation (hoisted out of the per-call path)
# ---------------------------------------------------------------------------
def prepare_params(params, *, bf16_epilogue=None):
    """Cast weights to bf16, lane-pad fc3 to a multiple of 128, reshape biases
    to (1, out) in the epilogue dtype.  Run once; reuse across forward calls."""
    if bf16_epilogue is None:
        bf16_epilogue = _default_bf16_epilogue()
    ep = jnp.bfloat16 if bf16_epilogue else jnp.float32

    S, H = params["w1"].shape
    A = params["w3"].shape[1]
    A_pad = _round_up(A, 128)

    prepared = {
        "w1": params["w1"].astype(jnp.bfloat16),                             # (S, H)
        "w2": params["w2"].astype(jnp.bfloat16),                             # (H, H)
        "w3": jnp.pad(params["w3"].astype(jnp.bfloat16),
                      ((0, 0), (0, A_pad - A))),                             # (H, A_pad)
        "b1": params["b1"].reshape(1, H).astype(ep),
        "b2": params["b2"].reshape(1, H).astype(ep),
        "b3": jnp.pad(params["b3"].reshape(1, A).astype(jnp.float32),
                      ((0, 0), (0, A_pad - A))),                             # (1, A_pad)
        "action_size": A,
    }
    return prepared


# ---------------------------------------------------------------------------
# Forward wrapper
# ---------------------------------------------------------------------------
def old_qnetwork_forward(x, prepared, *, tile_b=None):
    """x: (B, state_size) f32.  Returns (B, action_size) f32."""
    B, S = x.shape
    H = prepared["w1"].shape[1]
    A_pad = prepared["w3"].shape[1]
    A = prepared["action_size"]

    if tile_b is None:
        tile_b = _choose_tile_b(B)
    tile_b = _round_up(tile_b, 16)              # bf16 sublane packing
    B_pad = _round_up(B, tile_b)

    # Only per-call data prep: pad + cast the streamed activations.
    xb = jnp.pad(x.astype(jnp.bfloat16), ((0, B_pad - B), (0, 0)))

    grid = (B_pad // tile_b,)

    out = pl.pallas_call(
        qnet_kernel,
        out_shape=jax.ShapeDtypeStruct((B_pad, A_pad), jnp.bfloat16),
        grid_spec=pltpu.PrefetchScalarGridSpec(
            num_scalar_prefetch=0,
            grid=grid,
            in_specs=[
                # streamed per batch tile
                pl.BlockSpec((tile_b, S), lambda i: (i, 0)),
                # weights / biases: constant block index -> resident in VMEM
                pl.BlockSpec((S, H), lambda i: (0, 0)),
                pl.BlockSpec((1, H), lambda i: (0, 0)),
                pl.BlockSpec((H, H), lambda i: (0, 0)),
                pl.BlockSpec((1, H), lambda i: (0, 0)),
                pl.BlockSpec((H, A_pad), lambda i: (0, 0)),
                pl.BlockSpec((1, A_pad), lambda i: (0, 0)),
            ],
            out_specs=pl.BlockSpec((tile_b, A_pad), lambda i: (i, 0)),
        ),
        compiler_params=pltpu.CompilerParams(
            dimension_semantics=("parallel",),   # shard batch tiles across TCs (v7x)
            vmem_limit_bytes=40 << 20,           # headroom for tile_b up to 2048
        ),
    )(xb, prepared["w1"], prepared["b1"], prepared["w2"], prepared["b2"],
      prepared["w3"], prepared["b3"])

    return out[:B, :A].astype(jnp.float32)


# ---------------------------------------------------------------------------
# Init + reference (mirrors the kernel's cast chain exactly)
# ---------------------------------------------------------------------------
def init_params(key, state_size, action_size, hidden=HIDDEN):
    """Mimics nn.Linear default init (uniform +-1/sqrt(fan_in)).
    Weights stored pre-transposed as (in_features, out_features)."""
    ks = jax.random.split(key, 6)

    def lin(kw, kb, fan_in, fan_out):
        bound = 1.0 / jnp.sqrt(jnp.float32(fan_in))
        w = jax.random.uniform(kw, (fan_in, fan_out), jnp.float32, -bound, bound)
        b = jax.random.uniform(kb, (fan_out,), jnp.float32, -bound, bound)
        return w, b

    p = {}
    p["w1"], p["b1"] = lin(ks[0], ks[1], state_size, hidden)
    p["w2"], p["b2"] = lin(ks[2], ks[3], hidden, hidden)
    p["w3"], p["b3"] = lin(ks[4], ks[5], hidden, action_size)
    return p


def reference_forward(x, prepared):
    """Pure-JAX reference with the same bf16/epilogue casts as the kernel."""
    A = prepared["action_size"]
    ep = prepared["b1"].dtype
    xb = x.astype(jnp.bfloat16)
    h = jnp.maximum(
        jnp.dot(xb, prepared["w1"], preferred_element_type=jnp.float32).astype(ep)
        + prepared["b1"], 0)
    y = jnp.maximum(
        jnp.dot(h.astype(jnp.bfloat16), prepared["w2"],
                preferred_element_type=jnp.float32).astype(ep)
        + prepared["b2"], 0)
    out = (jnp.dot((h + y).astype(jnp.bfloat16), prepared["w3"],
                   preferred_element_type=jnp.float32) + prepared["b3"])
    return out[:, :A].astype(jnp.bfloat16).astype(jnp.float32)


if __name__ == "__main__":
    # small shapes consistent with the module: hidden layers fixed at 256
    B, STATE, ACTION = 2, 16, 8

    key = jax.random.PRNGKey(0)
    k_x, k_p = jax.random.split(key)

    x = jax.random.normal(k_x, (B, STATE), jnp.float32)
    params = init_params(k_p, STATE, ACTION)
    prepared = prepare_params(params)          # one-time weight prep

    q = old_qnetwork_forward(x, prepared)
    q = jax.block_until_ready(q)

    q_ref = reference_forward(x, prepared)
    assert q.shape == (B, ACTION), q.shape
    assert jnp.allclose(q, q_ref, atol=2e-2, rtol=2e-2), (q, q_ref)

    print("KERNEL_OK")
</pallas_src>

<mosaic_0001>
module attributes {stable_mosaic.version = 11 : i64} {
  func.func @qnet_kernel(%arg0: i32, %arg1: memref<16x16xbf16, #tpu.memory_space<vmem>>, %arg2: memref<16x256xbf16, #tpu.memory_space<vmem>>, %arg3: memref<1x256xbf16, #tpu.memory_space<vmem>>, %arg4: memref<256x256xbf16, #tpu.memory_space<vmem>>, %arg5: memref<1x256xbf16, #tpu.memory_space<vmem>>, %arg6: memref<256x128xbf16, #tpu.memory_space<vmem>>, %arg7: memref<1x128xf32, #tpu.memory_space<vmem>>, %arg8: memref<16x128xbf16, #tpu.memory_space<vmem>>) attributes {dimension_semantics = [#tpu.dimension_semantics<parallel>], iteration_bounds = array<i64: 1>, scalar_prefetch = 0 : i64, scratch_operands = 0 : i64, tpu.core_type = #tpu.core_type<tc>, window_params = [{transform_indices = @transform_0, window_bounds = array<i64: 16, 16>}, {pipeline_mode = #tpu.pipeline_mode<synchronous>, transform_indices = @transform_1, window_bounds = array<i64: 16, 256>}, {pipeline_mode = #tpu.pipeline_mode<synchronous>, transform_indices = @transform_2, window_bounds = array<i64: 1, 256>}, {pipeline_mode = #tpu.pipeline_mode<synchronous>, transform_indices = @transform_3, window_bounds = array<i64: 256, 256>}, {pipeline_mode = #tpu.pipeline_mode<synchronous>, transform_indices = @transform_4, window_bounds = array<i64: 1, 256>}, {pipeline_mode = #tpu.pipeline_mode<synchronous>, transform_indices = @transform_5, window_bounds = array<i64: 256, 128>}, {pipeline_mode = #tpu.pipeline_mode<synchronous>, transform_indices = @transform_6, window_bounds = array<i64: 1, 128>}, {transform_indices = @transform_7, window_bounds = array<i64: 16, 128>}]} {
    %c0 = arith.constant 0 : index
    %c0_0 = arith.constant 0 : index
    %0 = vector.load %arg1[%c0, %c0_0] : memref<16x16xbf16, #tpu.memory_space<vmem>>, vector<16x16xbf16>
    %c0_1 = arith.constant 0 : index
    %c0_2 = arith.constant 0 : index
    %1 = vector.load %arg2[%c0_1, %c0_2] : memref<16x256xbf16, #tpu.memory_space<vmem>>, vector<16x256xbf16>
    %cst = arith.constant dense<0.000000e+00> : vector<16x256xf32>
    %2 = tpu.matmul %0, %1, %cst {dimension_numbers = #tpu.dot_dimension_numbers<[1], [0], [0], [1], [0, 0, 1, 1], [], []>} : vector<16x16xbf16>, vector<16x256xbf16>, vector<16x256xf32> -> vector<16x256xf32>
    %3 = arith.truncf %2 : vector<16x256xf32> to vector<16x256xbf16>
    %c0_3 = arith.constant 0 : index
    %c0_4 = arith.constant 0 : index
    %4 = vector.load %arg3[%c0_3, %c0_4] : memref<1x256xbf16, #tpu.memory_space<vmem>>, vector<1x256xbf16>
    %5 = vector.broadcast %4 : vector<1x256xbf16> to vector<16x256xbf16>
    %6 = arith.addf %3, %5 : vector<16x256xbf16>
    %cst_5 = arith.constant 0.000000e+00 : bf16
    %7 = vector.broadcast %cst_5 : bf16 to vector<16x256xbf16>
    %8 = arith.maximumf %6, %7 : vector<16x256xbf16>
    %c0_6 = arith.constant 0 : index
    %c0_7 = arith.constant 0 : index
    %9 = vector.load %arg4[%c0_6, %c0_7] : memref<256x256xbf16, #tpu.memory_space<vmem>>, vector<256x256xbf16>
    %cst_8 = arith.constant dense<0.000000e+00> : vector<16x256xf32>
    %10 = tpu.matmul %8, %9, %cst_8 {dimension_numbers = #tpu.dot_dimension_numbers<[1], [0], [0], [1], [0, 0, 1, 1], [], []>} : vector<16x256xbf16>, vector<256x256xbf16>, vector<16x256xf32> -> vector<16x256xf32>
    %11 = arith.truncf %10 : vector<16x256xf32> to vector<16x256xbf16>
    %c0_9 = arith.constant 0 : index
    %c0_10 = arith.constant 0 : index
    %12 = vector.load %arg5[%c0_9, %c0_10] : memref<1x256xbf16, #tpu.memory_space<vmem>>, vector<1x256xbf16>
    %13 = vector.broadcast %12 : vector<1x256xbf16> to vector<16x256xbf16>
    %14 = arith.addf %11, %13 : vector<16x256xbf16>
    %cst_11 = arith.constant 0.000000e+00 : bf16
    %15 = vector.broadcast %cst_11 : bf16 to vector<16x256xbf16>
    %16 = arith.maximumf %14, %15 : vector<16x256xbf16>
    %17 = arith.addf %8, %16 : vector<16x256xbf16>
    %c0_12 = arith.constant 0 : index
    %c0_13 = arith.constant 0 : index
    %18 = vector.load %arg6[%c0_12, %c0_13] : memref<256x128xbf16, #tpu.memory_space<vmem>>, vector<256x128xbf16>
    %cst_14 = arith.constant dense<0.000000e+00> : vector<16x128xf32>
    %19 = tpu.matmul %17, %18, %cst_14 {dimension_numbers = #tpu.dot_dimension_numbers<[1], [0], [0], [1], [0, 0, 1, 1], [], []>} : vector<16x256xbf16>, vector<256x128xbf16>, vector<16x128xf32> -> vector<16x128xf32>
    %c0_15 = arith.constant 0 : index
    %c0_16 = arith.constant 0 : index
    %20 = vector.load %arg7[%c0_15, %c0_16] : memref<1x128xf32, #tpu.memory_space<vmem>>, vector<1x128xf32>
    %21 = vector.broadcast %20 : vector<1x128xf32> to vector<16x128xf32>
    %22 = arith.addf %19, %21 : vector<16x128xf32>
    %23 = arith.truncf %22 : vector<16x128xf32> to vector<16x128xbf16>
    %c0_17 = arith.constant 0 : index
    %c0_18 = arith.constant 0 : index
    %24 = vector.load %arg8[%c0_17, %c0_18] : memref<16x128xbf16, #tpu.memory_space<vmem>>, vector<16x128xbf16>
    tpu.vector_store %arg8[%c0_17, %c0_18], %23 {strides = array<i32>} : memref<16x128xbf16, #tpu.memory_space<vmem>>, vector<16x128xbf16>,
    return
  }
  func.func @transform_0(%arg0: i32) -> (i32, i32) {
    %c0_i32 = arith.constant 0 : i32
    %c0_i32_0 = arith.constant 0 : i32
    return %arg0, %c0_i32 : i32, i32
  }
  func.func @transform_1(%arg0: i32) -> (i32, i32) {
    %c0_i32 = arith.constant 0 : i32
    %c0_i32_0 = arith.constant 0 : i32
    %c0_i32_1 = arith.constant 0 : i32
    return %c0_i32, %c0_i32_0 : i32, i32
  }
  func.func @transform_2(%arg0: i32) -> (i32, i32) {
    %c0_i32 = arith.constant 0 : i32
    %c0_i32_0 = arith.constant 0 : i32
    %c0_i32_1 = arith.constant 0 : i32
    return %c0_i32, %c0_i32_0 : i32, i32
  }
  func.func @transform_3(%arg0: i32) -> (i32, i32) {
    %c0_i32 = arith.constant 0 : i32
    %c0_i32_0 = arith.constant 0 : i32
    %c0_i32_1 = arith.constant 0 : i32
    return %c0_i32, %c0_i32_0 : i32, i32
  }
  func.func @transform_4(%arg0: i32) -> (i32, i32) {
    %c0_i32 = arith.constant 0 : i32
    %c0_i32_0 = arith.constant 0 : i32
    %c0_i32_1 = arith.constant 0 : i32
    return %c0_i32, %c0_i32_0 : i32, i32
  }
  func.func @transform_5(%arg0: i32) -> (i32, i32) {
    %c0_i32 = arith.constant 0 : i32
    %c0_i32_0 = arith.constant 0 : i32
    %c0_i32_1 = arith.constant 0 : i32
    return %c0_i32, %c0_i32_0 : i32, i32
  }
  func.func @transform_6(%arg0: i32) -> (i32, i32) {
    %c0_i32 = arith.constant 0 : i32
    %c0_i32_0 = arith.constant 0 : i32
    %c0_i32_1 = arith.constant 0 : i32
    return %c0_i32, %c0_i32_0 : i32, i32
  }
  func.func @transform_7(%arg0: i32) -> (i32, i32) {
    %c0_i32 = arith.constant 0 : i32
    %c0_i32_0 = arith.constant 0 : i32
    return %arg0, %c0_i32 : i32, i32
  }
}

</mosaic_0001>

<bundles_post_ra>
// kernel: tpu_custom_call.1
= control target key start
LH: loop header
LB: loop body
LE: loop exit
PB: predicated region body
PF: predicated region fallthrough
CT: control target
= control target key end

     0   :  { %12 = vsyncpa [#allocation3], 0  ;;  %s1109_s0 = inlined_call_operand.hbm [shape: bf16[16,16], index: 0, kind: input, shape index: {}]   ;;  %s1110_s1 = inlined_call_operand.hbm [shape: bf16[16,256], index: 1, kind: input, shape index: {}]   ;;  %s1111_s2 = inlined_call_operand.vmem [shape: bf16[1,256], index: 2, kind: input, shape index: {}]   ;;  %s1112_s3 = inlined_call_operand.hbm [shape: bf16[256,256], index: 3, kind: input, shape index: {}]   ;;  %s1113_s4 = inlined_call_operand.vmem [shape: bf16[1,256], index: 4, kind: input, shape index: {}]   ;;  %s1114_s5 = inlined_call_operand.hbm [shape: bf16[256,128], index: 5, kind: input, shape index: {}]   ;;  %s1115_s6 = inlined_call_operand.vmem [shape: f32[1,128], index: 6, kind: input, shape index: {}]   ;;  %s1116_s7 = inlined_call_operand.hbm [shape: bf16[16,128], index: 7, kind: output, shape index: {}]  }
   0x1   :  { %13 = vsyncpa [#allocation6], 0 }
   0x2   :  { %14 = vsyncpa [#allocation9], 0 }
   0x3   :  { %15 = vsyncpa [#allocation4], 0  ;;  %s962_s24 = smov [#allocation5]   ;;  %s844_s28 = scalar_lea.hbm %s1110_s1, 256 }
   0x4   :  { %s33_s25 = sshll.u32 %s962_s24, 4  ;;  %p845_p0 = scmp.ne.s32.totalorder %s1110_s1, %s844_s28  ;;  %s34_s25 = int_to_ptr.vmem [resolvable:$true] %s33_s25 }
   0x5   :  { %p848_p1 = scmp.lt.u32.totalorder %s844_s28, %s1110_s1 }
   0x7   :  { %p850_p2 = pnand %p848_p1, %p845_p0 }
   0x9   :  { %853 = shalt.err (!%p850_p2)
}
   0xa   :  { %s854_s10 = scalar_lea.vmem %s34_s25, 256  ;;  %p859_p4 = scmp.lt.s32.totalorder %s34_s25, %s34_s25 }
   0xb   :  { %p855_p3 = scmp.ne.s32.totalorder %s34_s25, %s854_s10  ;;  %p860_p5 = scmp.lt.s32.totalorder %s854_s10, %s854_s10 }
   0xd   :  { %p861_p6 = por %p860_p5, %p859_p4 }
   0xf   :  { %p862_p7 = pnand %p861_p6, %p855_p3 }
  0x11   :  { %865 = shalt.err (!%p862_p7)
}
  0x12   :  { %s963_s11 = smov 128   ;;  %s964_s12 = smov 8  }
  0x13   :  { %39 = dma.hbm_to_vmem [thread:$0]  %s1110_s1, 256, %s34_s25, [#allocation6], %s963_s11, %s963_s11, %s964_s12  }
  0x14   :  { %s965_s15 = smov [#allocation2]   ;;  %s866_s19 = scalar_lea.hbm %s1109_s0, 128 }
  0x15   :  { %s21_s16 = sshll.u32 %s965_s15, 4  ;;  %p867_p8 = scmp.ne.s32.totalorder %s1109_s0, %s866_s19  ;;  %s22_s16 = int_to_ptr.vmem [resolvable:$true] %s21_s16 }
  0x16   :  { %p870_p9 = scmp.lt.u32.totalorder %s866_s19, %s1109_s0 }
  0x18   :  { %p872_p10 = pnand %p870_p9, %p867_p8 }
  0x1a   :  { %875 = shalt.err (!%p872_p10)
}
  0x1b   :  { %s876_s24 = scalar_lea.vmem %s22_s16, 128  ;;  %p881_p12 = scmp.lt.s32.totalorder %s22_s16, %s22_s16 }
  0x1c   :  { %p877_p11 = scmp.ne.s32.totalorder %s22_s16, %s876_s24  ;;  %p882_p13 = scmp.lt.s32.totalorder %s876_s24, %s876_s24 }
  0x1e   :  { %p883_p0 = por %p882_p13, %p881_p12 }
  0x20   :  { %p884_p1 = pnand %p883_p0, %p877_p11 }
  0x22   :  { %887 = shalt.err (!%p884_p1)
}
  0x23   :  { %s966_s1 = smov 64   ;;  %s967_s25 = smov 4  }
  0x24   :  { %27 = dma.hbm_to_vmem [thread:$0]  %s1109_s0, 128, %s22_s16, [#allocation3], %s966_s1, %s966_s1, %s967_s25  }
  0x25   :  { %s968_s28 = smov [#allocation7]   ;;  %s969_s30 = smov [#allocation8]  }
  0x26   :  { %s47_s29 = sshll.u32 %s968_s28, 4  ;;  %s61_s8 = sshll.u32 %s969_s30, 4  ;;  %s48_s29 = int_to_ptr.vmem [resolvable:$true] %s47_s29  ;;  %s1043_s8 = int_to_ptr.vmem [resolvable:$true] %s61_s8 }
  0x27   :  { %s888_s13 = scalar_lea.hbm %s1112_s3, 4096 }
  0x28   :  { %p889_p2 = scmp.ne.s32.totalorder %s1112_s3, %s888_s13  ;;  %p892_p3 = scmp.lt.u32.totalorder %s888_s13, %s1112_s3 }
  0x2a   :  { %p894_p4 = pnand %p892_p3, %p889_p2 }
  0x2c   :  { %897 = shalt.err (!%p894_p4)
}
  0x2d   :  { %s898_s0 = scalar_lea.vmem %s48_s29, 4096  ;;  %p903_p6 = scmp.lt.s32.totalorder %s48_s29, %s48_s29 }
  0x2e   :  { %p899_p5 = scmp.ne.s32.totalorder %s48_s29, %s898_s0  ;;  %p904_p7 = scmp.lt.s32.totalorder %s898_s0, %s898_s0 }
  0x30   :  { %p905_p8 = por %p904_p7, %p903_p6 }
  0x32   :  { %p906_p9 = pnand %p905_p8, %p899_p5 }
  0x34   :  { %909 = shalt.err (!%p906_p9)
}
  0x35   :  { %53 = dma.hbm_to_vmem [thread:$0]  %s1112_s3, 4096, %s48_s29, [#allocation6], %s963_s11, %s963_s11, %s964_s12  }
  0x36   :  { %s910_s22 = scalar_lea.hbm %s1114_s5, 2048 }
  0x37   :  { %p911_p10 = scmp.ne.s32.totalorder %s1114_s5, %s910_s22  ;;  %p914_p11 = scmp.lt.u32.totalorder %s910_s22, %s1114_s5 }
  0x39   :  { %p916_p12 = pnand %p914_p11, %p911_p10 }
  0x3b   :  { %919 = shalt.err (!%p916_p12)
}
  0x3c   :  { %s920_s28 = scalar_lea.vmem %s1043_s8, 2048  ;;  %p925_p0 = scmp.lt.s32.totalorder %s1043_s8, %s1043_s8 }
  0x3d   :  { %p921_p13 = scmp.ne.s32.totalorder %s1043_s8, %s920_s28  ;;  %p926_p1 = scmp.lt.s32.totalorder %s920_s28, %s920_s28 }
  0x3f   :  { %p927_p2 = por %p926_p1, %p925_p0 }
  0x41   :  { %p928_p3 = pnand %p927_p2, %p921_p13 }
  0x43   :  { %931 = shalt.err (!%p928_p3)
}
  0x44   :  { %67 = dma.hbm_to_vmem [thread:$0]  %s1114_s5, 2048, %s1043_s8, [#allocation9], %s966_s1, %s966_s1, %s967_s25  }
  0x45   :  { %954 = dma.done.wait [#allocation3], 128  }
  0x46   :  { %955 = vsyncadd [#allocation3], 4294967168 }
  0x47   :  { %956 = dma.done.wait [#allocation6], 4352  }
  0x48   :  { %957 = vsyncadd [#allocation6], 4294962944 }
  0x49   :  { %958 = dma.done.wait [#allocation9], 2048  }
  0x4a   :  { %959 = vsyncadd [#allocation9], 4294965248  ;;  %v970_v0 = vmov 0   ;;  %v776_v1 = vld [vmem:[#allocation5 + $0x4] ss:$8 sps:$4 sm:$0xff]   ;;  %v779_v3 = vld [vmem:[#allocation2] sm:$0xff]   ;;  %v164_v48 = vlaneseq }
  0x4b   :  { %138 = vmatprep.mubr.bf16.mxu0 %v970_v0  ;;  %v778_v2 = vld [vmem:[#allocation5] ss:$8 sps:$4 sm:$0xff]   ;;  %106 = vmatprep.subr.bf16.mxu0 %v776_v1  ;;  %vm102_vm0 = vcmask 130048   ;;  %v780_v4 = vld [vmem:[#allocation7 + $0x4] ss:$8 sps:$4 sm:$0xff]   ;;  %s972_s8 = smov [#allocation10]  }
  0x4c   :  { %107 = vmatpush1.bf16.msra.mxu0 %v778_v2  ;;  %v782_v5 = vld [vmem:[#allocation7] ss:$8 sps:$4 sm:$0xff]   ;;  %v783_v6 = vld [vmem:[#allocation7 + $0x14] ss:$8 sps:$4 sm:$0xff]   ;;  %385 = vmatprep.subr.bf16.mxu1 %v780_v4  ;;  %v785_v7 = vld [vmem:[#allocation7 + $0x10] ss:$8 sps:$4 sm:$0xff]  }
  0x4d   :  { %386 = vmatpush1.bf16.msra.mxu1 %v782_v5  ;;  %v786_v8 = vld [vmem:[#allocation7 + $0x24] ss:$8 sps:$4 sm:$0xff]   ;;  %v788_v9 = vld [vmem:[#allocation7 + $0x20] ss:$8 sps:$4 sm:$0xff]   ;;  %v789_v10 = vld [vmem:[#allocation7 + $0x34] ss:$8 sps:$4 sm:$0xff]  }
  0x4e   :  { %387 = vmatprep.subr.bf16.mxu1 %v783_v6  ;;  %v791_v11 = vld [vmem:[#allocation7 + $0x30] ss:$8 sps:$4 sm:$0xff]   ;;  %v792_v12 = vld [vmem:[#allocation7 + $0x44] ss:$8 sps:$4 sm:$0xff]   ;;  %v794_v13 = vld [vmem:[#allocation7 + $0x40] ss:$8 sps:$4 sm:$0xff]  }
  0x4f   :  { %682 = vmatmul.mubr.msk.bf16.vlgmr.msra.gmra.mrb[0].mxu0 %vm102_vm0, %v779_v3  ;;  %v795_v14 = vld [vmem:[#allocation7 + $0x54] ss:$8 sps:$4 sm:$0xff]   ;;  %v797_v15 = vld [vmem:[#allocation7 + $0x50] ss:$8 sps:$4 sm:$0xff]   ;;  %v798_v16 = vld [vmem:[#allocation7 + $0x64] ss:$8 sps:$4 sm:$0xff]  }
  0x50   :  { %v800_v17 = vld [vmem:[#allocation7 + $0x60] ss:$8 sps:$4 sm:$0xff]   ;;  %v801_v18 = vld [vmem:[#allocation7 + $0x74] ss:$8 sps:$4 sm:$0xff]   ;;  %v803_v19 = vld [vmem:[#allocation7 + $0x70] ss:$8 sps:$4 sm:$0xff]  }
  0x51   :  { %388 = vmatpush1.bf16.msra.mxu1 %v785_v7  ;;  %v804_v20 = vld [vmem:[#allocation7 + $0x84] ss:$8 sps:$4 sm:$0xff]   ;;  %v806_v21 = vld [vmem:[#allocation7 + $0x80] ss:$8 sps:$4 sm:$0xff]   ;;  %v807_v22 = vld [vmem:[#allocation7 + $0x94] ss:$8 sps:$4 sm:$0xff]  }
  0x52   :  { %389 = vmatprep.subr.bf16.mxu1 %v786_v8  ;;  %v809_v23 = vld [vmem:[#allocation7 + $0x90] ss:$8 sps:$4 sm:$0xff]   ;;  %v810_v24 = vld [vmem:[#allocation7 + $0xa4] ss:$8 sps:$4 sm:$0xff]   ;;  %v812_v25 = vld [vmem:[#allocation7 + $0xa0] ss:$8 sps:$4 sm:$0xff]  }
  0x53   :  { %v813_v26 = vld [vmem:[#allocation7 + $0xb4] ss:$8 sps:$4 sm:$0xff]   ;;  %v815_v27 = vld [vmem:[#allocation7 + $0xb0] ss:$8 sps:$4 sm:$0xff]   ;;  %v816_v28 = vld [vmem:[#allocation7 + $0xc4] ss:$8 sps:$4 sm:$0xff]  }
  0x54   :  { %v818_v29 = vld [vmem:[#allocation7 + $0xc0] ss:$8 sps:$4 sm:$0xff]   ;;  %v819_v30 = vld [vmem:[#allocation7 + $0xd4] ss:$8 sps:$4 sm:$0xff]   ;;  %v821_v31 = vld [vmem:[#allocation7 + $0xd0] ss:$8 sps:$4 sm:$0xff]  }
  0x55   :  { %390 = vmatpush1.bf16.msra.mxu1 %v788_v9  ;;  %v822_v32 = vld [vmem:[#allocation7 + $0xe4] ss:$8 sps:$4 sm:$0xff]   ;;  %v824_v33 = vld [vmem:[#allocation7 + $0xe0] ss:$8 sps:$4 sm:$0xff]   ;;  %v825_v34 = vld [vmem:[#allocation7 + $0xf4] ss:$8 sps:$4 sm:$0xff]  }
  0x56   :  { %391 = vmatprep.subr.bf16.mxu1 %v789_v10  ;;  %v827_v35 = vld [vmem:[#allocation7 + $0xf0] ss:$8 sps:$4 sm:$0xff]   ;;  %v828_v36 = vld [vmem:[#allocation8 + $0x40] sm:$0xff]   ;;  %v830_v38 = vld [vmem:[#allocation8 + $0x48] sm:$0xff]   ;;  %v971_v46 = vmov 1966171168  }
  0x57   :  { %v829_v37 = vld [vmem:[#allocation8] sm:$0xff]   ;;  %743 = vmatprep.subr.bf16.mxu0 %v828_v36  ;;  %v831_v39 = vld [vmem:[#allocation8 + $0x8] sm:$0xff]   ;;  %v832_v40 = vld [vmem:[#allocation8 + $0x50] sm:$0xff]   ;;  %v162_v47 = vunpack.c.l.s4 %v971_v46  ;;  %v165_v50 = vshrl.u32 %v164_v48, 7  ;;  %s665_s9 = sshll.u32 %s972_s8, 4  ;;  %s666_s9 = int_to_ptr.vmem [resolvable:$true] %s665_s9 }
  0x58   :  { %744 = vmatpush3.bf16.msra.mxu0 %v829_v37  ;;  %v833_v41 = vld [vmem:[#allocation8 + $0x10] sm:$0xff]   ;;  %v834_v42 = vld [vmem:[#allocation8 + $0x58] sm:$0xff]   ;;  %v836_v44 = vld [vmem:[#allocation8 + $0x60] sm:$0xff]   ;;  %s932_s10 = scalar_lea.vmem %s666_s9, 128  ;;  %p937_p5 = scmp.lt.s32.totalorder %s666_s9, %s666_s9 }
  0x59   :  { %392 = vmatpush1.bf16.msra.mxu1 %v791_v11  ;;  %745 = vmatprep.subr.bf16.mxu0 %v830_v38  ;;  %v835_v43 = vld [vmem:[#allocation8 + $0x18] sm:$0xff]   ;;  %v837_v45 = vld [vmem:[#allocation8 + $0x20] sm:$0xff]   ;;  %v163_v49 = vunpack.c.0.s8 %v162_v47  ;;  %v683_v51 = vld.sshfl [vmem:[%s1111_s2] sm:$0x11 pattern:$0x75316420]  ;;  %p933_p4 = scmp.ne.s32.totalorder %s666_s9, %s932_s10  ;;  %p938_p6 = scmp.lt.s32.totalorder %s932_s10, %s932_s10 }
  0x5a   :  { %393 = vmatprep.subr.bf16.mxu1 %v792_v12  ;;  %v160_v53 = vcombine.high %v683_v51, %v683_v51  ;;  %v180_v57 = vsub.s32 0, %v165_v50  ;;  %v838_v8 = vld [vmem:[#allocation8 + $0x68] sm:$0xff]   ;;  %v840_v10 = vld [vmem:[#allocation8 + $0x70] sm:$0xff]   ;;  %v842_v12 = vld [vmem:[#allocation8 + $0x78] sm:$0xff]  }
  0x5b   :  { %v166_v52 = vsub.s32 %v163_v49, %v165_v50  ;;  %v839_v9 = vld [vmem:[#allocation8 + $0x28] sm:$0xff]   ;;  %v841_v11 = vld [vmem:[#allocation8 + $0x30] sm:$0xff]   ;;  %p939_p7 = por %p938_p6, %p937_p5 }
  0x5c   :  { %746 = vmatpush3.bf16.msra.mxu0 %v831_v39  ;;  %v717_v38 = vld [vmem:[%s1115_s6] ss:$0 sm:$0xff] }
  0x5d   :  { %394 = vmatpush1.bf16.msra.mxu1 %v794_v13  ;;  %747 = vmatprep.subr.bf16.mxu0 %v832_v40  ;;  %v167_v54 = vrot.slane %v683_v51, %v166_v52  ;;  %v174_v55 = vrot.slane %v160_v53, %v166_v52  ;;  %v843_v13 = vld [vmem:[#allocation8 + $0x38] sm:$0xff]   ;;  %p940_p8 = pnand %p939_p7, %p933_p4 }
  0x5e   :  { %395 = vmatprep.subr.bf16.mxu1 %v795_v14  ;;  %v716_v14 = vld.sshfl [vmem:[%s1113_s4] sm:$0x11 pattern:$0x75316420] }
  0x5f   :  { %v176_v56 = vpack.i.b16 %v167_v54, %v167_v54  ;;  %v183_v58 = vpack.i.b16 %v174_v55, %v174_v55 }
  0x60   :  { %748 = vmatpush3.bf16.msra.mxu0 %v833_v41 }
  0x61   :  { %396 = vmatpush1.bf16.msra.mxu1 %v797_v15  ;;  %749 = vmatprep.subr.bf16.mxu0 %v834_v42  ;;  %v181_v61 = vrot.slane %v176_v56, %v180_v57  ;;  %v188_v63 = vrot.slane %v183_v58, %v180_v57  ;;  %v439_v15 = vcombine.high %v716_v14, %v716_v14 }
  0x62   :  { %397 = vmatprep.subr.bf16.mxu1 %v798_v16  ;;  %v446_v16 = vrot.slane %v716_v14, %v166_v52 }
  0x64   :  { %750 = vmatpush3.bf16.msra.mxu0 %v835_v43 }
  0x65   :  { %398 = vmatpush1.bf16.msra.mxu1 %v800_v17  ;;  %751 = vmatprep.subr.bf16.mxu0 %v836_v44  ;;  %v453_v17 = vrot.slane %v439_v15, %v166_v52 }
  0x66   :  { %399 = vmatprep.subr.bf16.mxu1 %v801_v18  ;;  %v455_v18 = vpack.i.b16 %v446_v16, %v446_v16 }
  0x68   :  { %752 = vmatpush3.bf16.msra.mxu0 %v837_v45 }
  0x69   :  { %400 = vmatpush1.bf16.msra.mxu1 %v803_v19  ;;  %753 = vmatprep.subr.bf16.mxu0 %v838_v8  ;;  %v462_v19 = vpack.i.b16 %v453_v17, %v453_v17 }
  0x6a   :  { %401 = vmatprep.subr.bf16.mxu1 %v804_v20 }
  0x6c   :  { %754 = vmatpush3.bf16.msra.mxu0 %v839_v9 }
  0x6d   :  { %402 = vmatpush1.bf16.msra.mxu1 %v806_v21  ;;  %755 = vmatprep.subr.bf16.mxu0 %v840_v10 }
  0x6e   :  { %403 = vmatprep.subr.bf16.mxu1 %v807_v22  ;;  %v460_v22 = vrot.slane %v455_v18, %v180_v57 }
  0x70   :  { %756 = vmatpush3.bf16.msra.mxu0 %v841_v11 }
  0x71   :  { %404 = vmatpush1.bf16.msra.mxu1 %v809_v23  ;;  %757 = vmatprep.subr.bf16.mxu0 %v842_v12 }
  0x72   :  { %405 = vmatprep.subr.bf16.mxu1 %v810_v24  ;;  %v467_v24 = vrot.slane %v462_v19, %v180_v57 }
  0x74   :  { %758 = vmatpush3.bf16.msra.mxu0 %v843_v13 }
  0x75   :  { %406 = vmatpush1.bf16.msra.mxu1 %v812_v25 }
  0x76   :  { %407 = vmatprep.subr.bf16.mxu1 %v813_v26 }
  0x79   :  { %408 = vmatpush1.bf16.msra.mxu1 %v815_v27 }
  0x7a   :  { %409 = vmatprep.subr.bf16.mxu1 %v816_v28 }
  0x7d   :  { %410 = vmatpush1.bf16.msra.mxu1 %v818_v29 }
  0x7e   :  { %411 = vmatprep.subr.bf16.mxu1 %v819_v30 }
  0x81   :  { %412 = vmatpush1.bf16.msra.mxu1 %v821_v31 }
  0x82   :  { %413 = vmatprep.subr.bf16.mxu1 %v822_v32 }
  0x85   :  { %414 = vmatpush1.bf16.msra.mxu1 %v824_v33 }
  0x86   :  { %415 = vmatprep.subr.bf16.mxu1 %v825_v34 }
  0x89   :  { %416 = vmatpush1.bf16.msra.mxu1 %v827_v35 }
 0x122   :  { %v140_v59 = vpop.f32.mrb[0].mxu0 }
 0x123   :  { %v142_v60 = vpop.f32.mrb[1].mxu0 }
 0x124   :  { %v144_v62 = vpop.f32.mrb[2].mxu0 }
 0x125   :  { %v149_v1 = vpack.c.bf16 %v144_v62, %v140_v59  ;;  %v146_v2 = vpop.f32.mrb[3].mxu0 }
 0x126   :  { %v150_v3 = vpack.c.bf16 %v146_v2, %v142_v60 }
 0x127   :  { %v189_v4 = vadd.bf16 %v181_v61, %v149_v1 }
 0x128   :  { %v190_v5 = vadd.bf16 %v188_v63, %v150_v3 }
 0x129   :  { %v191_v7 = vmax.bf16 %v970_v0, %v189_v4 }
 0x12a   :  { %v192_v6 = vmax.bf16 %v970_v0, %v190_v5 }
 0x12c   :  { %417 = vmatprep.mubr.bf16.mxu1 %v192_v6 }
 0x12d   :  { %418 = vmatmul.mubr.bf16.vlgmr.msra.gmra.mrb[0].mxu1 %v191_v7 }
 0x200   :  { %v419_v20 = vpop.f32.mrb[0].mxu1 }
 0x201   :  { %v421_v21 = vpop.f32.mrb[1].mxu1 }
 0x202   :  { %v423_v23 = vpop.f32.mrb[2].mxu1 }
 0x203   :  { %v428_v25 = vpack.c.bf16 %v423_v23, %v419_v20  ;;  %v425_v26 = vpop.f32.mrb[3].mxu1 }
 0x204   :  { %v429_v27 = vpack.c.bf16 %v425_v26, %v421_v21 }
 0x205   :  { %v468_v28 = vadd.bf16 %v460_v22, %v428_v25 }
 0x206   :  { %v469_v29 = vadd.bf16 %v467_v24, %v429_v27 }
 0x207   :  { %v470_v30 = vmax.bf16 %v970_v0, %v468_v28 }
 0x208   :  { %v471_v31 = vmax.bf16 %v970_v0, %v469_v29 }
 0x209   :  { %v472_v33 = vadd.bf16 %v470_v30, %v191_v7 }
 0x20a   :  { %v473_v32 = vadd.bf16 %v471_v31, %v192_v6 }
 0x20c   :  { %641 = vmatprep.mubr.bf16.mxu0 %v473_v32 }
 0x20d   :  { %642 = vmatmul.mubr.bf16.vlgmr.msra.gmra.mrb[4].mxu0 %v472_v33 }
 0x2e0   :  { %v759_v34 = vpop.f32.mrb[4].mxu0 }
 0x2e1   :  { %v760_v35 = vpop.f32.mrb[5].mxu0 }
 0x2e2   :  { %v761_v36 = vadd.f32 %v760_v35, %v759_v34  ;;  %v762_v37 = vpop.f32.mrb[6].mxu0 }
 0x2e3   :  { %v763_v39 = vpop.f32.mrb[7].mxu0 }
 0x2e4   :  { %v764_v40 = vadd.f32 %v763_v39, %v762_v37  ;;  %v644_v41 = vadd.f32 %v761_v36, %v717_v38 }
 0x2e6   :  { %v647_v42 = vadd.f32 %v764_v40, %v717_v38 }
 0x2e8   :  { %v741_v43 = vpack.c.bf16 %v647_v42, %v644_v41 }
 0x2ea   :  { %742 = vst [vmem:[#allocation10] sm:$0xff] %v741_v43  }
 0x2eb   :  { %943 = shalt.err (!%p940_p8)
}
 0x2ec   :  { %s944_s6 = scalar_lea.hbm %s1116_s7, 128 }
 0x2ed   :  { %p945_p9 = scmp.ne.s32.totalorder %s1116_s7, %s944_s6  ;;  %p948_p10 = scmp.lt.u32.totalorder %s944_s6, %s1116_s7 }
 0x2ef   :  { %p950_p11 = pnand %p948_p10, %p945_p9 }
 0x2f1   :  { %953 = shalt.err (!%p950_p11)
}
 0x2f2   :  { %671 = dma.vmem_to_hbm [thread:$0]  %s666_s9, 128, %s1116_s7, [#allocation4], %s966_s1, %s966_s1, %s967_s25  }
 0x2f3   :  { %960 = dma.done.wait [#allocation4], 128  }
 0x2f4   :  { %961 = vsyncadd [#allocation4], 4294967168 }
 0x2f5   :  { %675 = vsyncpa [#allocation3], 1 }
 0x2f6   :  { %676 = vsyncpa [#allocation6], 1 }
 0x2f7   :  { %677 = vsyncpa [#allocation9], 1 }
 0x2f8   :  { %678 = vsyncpa [#allocation4], 1 }

</bundles_post_ra>
